<compile_context>
chip_gen: v7x
topology: tpu7x:2x2x1
jax: 0.10.0
libtpu: 0.0.40
codegen_flags: <defaults>
</compile_context>

<pallas_src>
import numpy as np
import jax
import jax.numpy as jnp
from jax.experimental import pallas as pl
from jax.experimental.pallas import tpu as pltpu

_HP = jax.lax.Precision.HIGHEST


# ----------------------------------------------------------------------------
# Kernel 1: row-tiled table projection  (table @ W), done once per table.
# ----------------------------------------------------------------------------
def _proj_kernel(a_ref, b_ref, o_ref):
    o_ref[...] = jnp.dot(a_ref[...], b_ref[...], preferred_element_type=jnp.float32)


def pallas_project_table(table, w, row_tile=512):
    R, K = table.shape
    K2, Dout = w.shape
    assert K == K2
    rt = R if R <= row_tile else row_tile
    grid = (pl.cdiv(R, rt),)
    return pl.pallas_call(
        _proj_kernel,
        out_shape=jax.ShapeDtypeStruct((R, Dout), jnp.float32),
        grid=grid,
        in_specs=[pl.BlockSpec((rt, K), lambda i: (i, 0)),
                  pl.BlockSpec((K, Dout), lambda i: (0, 0))],
        out_specs=pl.BlockSpec((rt, Dout), lambda i: (i, 0)),
        compiler_params=pltpu.CompilerParams(dimension_semantics=("parallel",)),
    )(table, w)


# ----------------------------------------------------------------------------
# Kernel 2: fused per-layer kernel
#   time-encode neighbors -> simple shared attention -> softmax -> ctx (MXU) ->
#   fc -> residual + layer_norm -> aggregation MLP.
# All [feat|edge|time] concatenations are expressed through pre-split weights and a
# constant placement matrix (pf / q_tconst), so only full-array elementwise ops,
# last-axis reductions and matmuls appear in the kernel.
# ----------------------------------------------------------------------------
def _fused_attn_kernel(src_ref, nf_ref, ne_ref, dt_ref, mask_ref,
                       freq_ref, phase_ref, pf_ref, qtc_ref, wq_ref,
                       wkf_ref, wke_ref, wkt_ref,
                       wfcf_ref, wfce_ref, wfct_ref,
                       lnw_ref, lnb_ref, w1h_ref, w1s_ref, w2_ref,
                       out_ref):
    src = src_ref[...]                       # [bt, D]   conv feature of the row itself
    nf = nf_ref[...]                         # [bt, N, D] neighbor conv features
    ne = ne_ref[...]                         # [bt, N, D] neighbor edge features
    dt = dt_ref[...]                         # [bt, N]   time deltas
    mask = mask_ref[...]                     # [bt, N]   1.0 == null neighbor

    # --- TimeEncode for neighbors: cos(dt * basis_freq + phase) ---------------
    freq = freq_ref[...]                     # [1, T]
    phase = phase_ref[...]                   # [1, T]
    t_emb = jnp.cos(dt[:, :, None] * freq[None, :, :] + phase[None, :, :])   # [bt, N, T]

    # --- q = [src | 0 | cos(phase)]  (lane placement via constant matmul) -----
    q_full = (jnp.dot(src, pf_ref[...], preferred_element_type=jnp.float32)
              + qtc_ref[...])                                                 # [bt, M]

    # --- simple shared attention scores ---------------------------------------
    score_q = jnp.sum(q_full * wq_ref[...], axis=-1, keepdims=True)           # [bt, 1]
    score_k = (jnp.sum(nf * wkf_ref[...][None, :, :], axis=-1)
               + jnp.sum(ne * wke_ref[...][None, :, :], axis=-1)
               + jnp.sum(t_emb * wkt_ref[...][None, :, :], axis=-1))          # [bt, N]
    scores = score_q + score_k
    scores = jnp.where(mask > 0.5, jnp.float32(-1e10), scores)

    m = jnp.max(scores, axis=-1, keepdims=True)
    e = jnp.exp(scores - m)
    p = e / jnp.sum(e, axis=-1, keepdims=True)                                # [bt, N]

    # --- ctx = attn @ v  (batched contraction over N, rides the MXU) ----------
    p3 = p[:, None, :]                                                        # [bt, 1, N]
    ctx_f = jnp.einsum('bqn,bnd->bqd', p3, nf,
                       preferred_element_type=jnp.float32)[:, 0, :]           # [bt, D]
    ctx_e = jnp.einsum('bqn,bnd->bqd', p3, ne,
                       preferred_element_type=jnp.float32)[:, 0, :]           # [bt, D]
    ctx_t = jnp.einsum('bqn,bnt->bqt', p3, t_emb,
                       preferred_element_type=jnp.float32)[:, 0, :]           # [bt, T]

    # --- fc: ctx @ fc_w.T, decomposed over the [feat|edge|time] row blocks ----
    fc_out = (jnp.dot(ctx_f, wfcf_ref[...], preferred_element_type=jnp.float32)
              + jnp.dot(ctx_e, wfce_ref[...], preferred_element_type=jnp.float32)
              + jnp.dot(ctx_t, wfct_ref[...], preferred_element_type=jnp.float32))  # [bt, M]

    # --- layer_norm(fc_out + q) ------------------------------------------------
    h = fc_out + q_full
    mu = jnp.mean(h, axis=-1, keepdims=True)
    var = jnp.mean(jnp.square(h - mu), axis=-1, keepdims=True)
    h = (h - mu) * jax.lax.rsqrt(var + jnp.float32(1e-5))
    h = h * lnw_ref[...] + lnb_ref[...]

    # --- aggregation MLP: relu([h | src] @ w1.T) @ w2.T ------------------------
    x = (jnp.dot(h, w1h_ref[...], preferred_element_type=jnp.float32)
         + jnp.dot(src, w1s_ref[...], preferred_element_type=jnp.float32))
    x = jnp.maximum(x, 0.0)
    out_ref[...] = jnp.dot(x, w2_ref[...], preferred_element_type=jnp.float32)


def fused_attn_layer(src_conv, ngh_feat, ngh_edge, dt, mask, C):
    B, D = src_conv.shape
    N = ngh_feat.shape[1]

    bt = B if B <= 128 else 128                     # batch-row tile (div-by-8 when tiled)
    grid = (pl.cdiv(B, bt),)

    def bmap2(i): return (i, 0)
    def bmap3(i): return (i, 0, 0)
    def wmap(i): return (0, 0)

    data = (src_conv, ngh_feat, ngh_edge, dt, mask)
    data_specs = [pl.BlockSpec((bt, D), bmap2),
                  pl.BlockSpec((bt, N, D), bmap3),
                  pl.BlockSpec((bt, N, D), bmap3),
                  pl.BlockSpec((bt, N), bmap2),
                  pl.BlockSpec((bt, N), bmap2)]

    weights = (C['freq'], C['phase'], C['pf'], C['q_tconst'], C['wq'],
               C['wk_f'], C['wk_e'], C['wk_t'],
               C['wfc_f'], C['wfc_e'], C['wfc_t'],
               C['ln_w'], C['ln_b'], C['w1h'], C['w1s'], C['w2'])
    weight_specs = [pl.BlockSpec(w.shape, wmap) for w in weights]

    return pl.pallas_call(
        _fused_attn_kernel,
        out_shape=jax.ShapeDtypeStruct((B, D), jnp.float32),
        grid=grid,
        in_specs=data_specs + weight_specs,
        out_specs=pl.BlockSpec((bt, D), bmap2),
        compiler_params=pltpu.CompilerParams(dimension_semantics=("parallel",)),
    )(*data, *weights)


# ----------------------------------------------------------------------------
# Mock neighbor finder (deterministic).  The real one walks a temporal graph on CPU.
# TODO(synk): ngh_finder.get_temporal_neighbor has no Pallas equivalent; mocked.
# ----------------------------------------------------------------------------
def mock_get_temporal_neighbor(src_idx, cut_time, num_neighbors, num_nodes, num_edges):
    src_idx = np.asarray(src_idx, dtype=np.int64)
    cut_time = np.asarray(cut_time, dtype=np.float32)
    ar = np.arange(num_neighbors)
    ngh_nodes = (src_idx[:, None] * 7 + ar[None, :] * 3 + 1) % num_nodes
    ngh_eidx = (src_idx[:, None] * 5 + ar[None, :] + 1) % num_edges
    ngh_t = cut_time[:, None] * (ar[None, :] + 1) / (num_neighbors + 1)
    null = ((src_idx[:, None] + ar[None, :]) % 5) == 0          # some padded slots
    ngh_nodes = np.where(null, 0, ngh_nodes)
    ngh_eidx = np.where(null, 0, ngh_eidx)
    ngh_t = np.where(null, 0.0, ngh_t).astype(np.float32)
    return ngh_nodes.astype(np.int64), ngh_eidx.astype(np.int64), ngh_t


# ----------------------------------------------------------------------------
# One-time constant / weight preparation (pre-projection, splits, hoisted constants).
# ----------------------------------------------------------------------------
def prepare_consts(params, cfg):
    D = cfg['embedding_dim']
    T = cfg['time_embedding_dim']
    M = 2 * D + T
    f32 = jnp.float32

    shared = params['shared_attn']              # [1, 2M]
    wq = shared[:, :M]
    wk = shared[:, M:]
    fc_wt = params['fc_w'].T                    # [M, M]
    w1t = params['agg_fc_w1'].T                 # [M+D, 2D]
    src_t = jnp.cos(params['phase'])[None, :]   # TimeEncode(0) == cos(phase), hoisted

    return {
        # whole tables projected once (Kernel 1); per-level work becomes a gather
        'proj_node': pallas_project_table(params['node_table'], params['node_w']),
        'proj_edge': pallas_project_table(params['edge_table'], params['edge_w']),
        'freq': params['basis_freq'][None, :],
        'phase': params['phase'][None, :],
        'pf': jnp.eye(D, M, dtype=f32),                                    # src -> lanes [0, D)
        'q_tconst': jnp.concatenate([jnp.zeros((1, 2 * D), f32), src_t], axis=1),  # [1, M]
        'wq': wq,
        'wk_f': wk[:, :D], 'wk_e': wk[:, D:2 * D], 'wk_t': wk[:, 2 * D:],
        'wfc_f': fc_wt[:D, :], 'wfc_e': fc_wt[D:2 * D, :], 'wfc_t': fc_wt[2 * D:, :],
        'ln_w': params['ln_w'][None, :], 'ln_b': params['ln_b'][None, :],
        'w1h': w1t[:M, :], 'w1s': w1t[M:, :],
        'w2': params['agg_fc_w2'].T,
    }


# ----------------------------------------------------------------------------
# TGNN_Encoder forward (tem_conv recursion).  All heavy math is in the fused kernel;
# gathers / index bookkeeping remain host/XLA glue.
# ----------------------------------------------------------------------------
def tem_conv(consts, cfg, src_idx, cut_time, curr_layers, num_neighbors):
    assert curr_layers >= 0
    src_idx = np.asarray(src_idx, dtype=np.int64)
    cut_time = np.asarray(cut_time, dtype=np.float32)
    B = src_idx.shape[0]
    D = cfg['embedding_dim']

    if curr_layers == 0:
        return consts['proj_node'][jnp.asarray(src_idx, jnp.int32)]     # gather (glue)

    ngh_nodes, ngh_eidx, ngh_t = mock_get_temporal_neighbor(
        src_idx, cut_time, num_neighbors, cfg['num_nodes'], cfg['num_edges'])
    dt = (cut_time[:, None] - ngh_t).astype(np.float32)                 # [B, N]

    # batched recursion: src rows and flattened neighbor rows in ONE call
    all_idx = np.concatenate([src_idx, ngh_nodes.reshape(-1)])
    all_t = np.concatenate([cut_time, ngh_t.reshape(-1)])
    all_conv = tem_conv(consts, cfg, all_idx, all_t, curr_layers - 1, num_neighbors)
    src_conv = all_conv[:B]                                             # [B, D]
    ngh_feat = all_conv[B:].reshape(B, num_neighbors, D)                # [B, N, D]

    ngh_edge = consts['proj_edge'][jnp.asarray(ngh_eidx.reshape(-1), jnp.int32)]
    ngh_edge = ngh_edge.reshape(B, num_neighbors, D)

    # TODO(synk): null neighbors are detected by node id == 0 (mock sampler convention).
    mask = jnp.asarray((ngh_nodes == 0).astype(np.float32))             # [B, N]

    return fused_attn_layer(src_conv, ngh_feat, ngh_edge, jnp.asarray(dt), mask, consts)


def tgnn_forward(consts, cfg, src_idx_l, target_idx_l, cut_time_l, num_neighbors):
    B = len(src_idx_l)
    all_idx = np.concatenate([np.asarray(src_idx_l), np.asarray(target_idx_l)])
    all_t = np.concatenate([np.asarray(cut_time_l, np.float32),
                            np.asarray(cut_time_l, np.float32)])
    emb = tem_conv(consts, cfg, all_idx, all_t, cfg['num_layers'], num_neighbors)
    return emb[:B], emb[B:]


# ----------------------------------------------------------------------------
# Pure-JAX reference (original, un-batched recursion) for numerical validation.
# ----------------------------------------------------------------------------
def _ref_attn_layer(params, cfg, src_conv, ngh_feat, ngh_edge, dt, mask_bool):
    D, T = cfg['embedding_dim'], cfg['time_embedding_dim']
    M = 2 * D + T
    B, N = mask_bool.shape
    t_emb = jnp.cos(dt[:, :, None] * params['basis_freq'][None, None, :]
                    + params['phase'][None, None, :])
    src_t = jnp.broadcast_to(jnp.cos(params['phase'])[None, :], (B, T))
    q = jnp.concatenate([src_conv, jnp.zeros_like(src_conv), src_t], axis=-1)     # [B, M]
    k = jnp.concatenate([ngh_feat, ngh_edge, t_emb], axis=-1)                     # [B, N, M]
    wq = params['shared_attn'][:, :M]
    wk = params['shared_attn'][:, M:]
    scores = (jnp.sum(q * wq, axis=-1, keepdims=True)
              + jnp.einsum('bnm,m->bn', k, wk[0], precision=_HP))
    scores = jnp.where(mask_bool, jnp.float32(-1e10), scores)
    p = jax.nn.softmax(scores, axis=-1)
    ctx = jnp.einsum('bn,bnm->bm', p, k, precision=_HP)
    out = jnp.dot(ctx, params['fc_w'].T, precision=_HP)
    h = out + q
    mu = jnp.mean(h, -1, keepdims=True)
    var = jnp.mean((h - mu) ** 2, -1, keepdims=True)
    h = (h - mu) / jnp.sqrt(var + 1e-5)
    h = h * params['ln_w'] + params['ln_b']
    x = jax.nn.relu(jnp.dot(jnp.concatenate([h, src_conv], axis=-1),
                            params['agg_fc_w1'].T, precision=_HP))
    return jnp.dot(x, params['agg_fc_w2'].T, precision=_HP)


def _ref_tem_conv(params, cfg, src_idx, cut_time, L, num_neighbors):
    src_idx = np.asarray(src_idx, np.int64)
    cut_time = np.asarray(cut_time, np.float32)
    B, D = src_idx.shape[0], cfg['embedding_dim']
    node_emb = params['node_table'][jnp.asarray(src_idx, jnp.int32)]
    src_feat = jnp.dot(node_emb, params['node_w'], precision=_HP)
    if L == 0:
        return src_feat
    src_conv = _ref_tem_conv(params, cfg, src_idx, cut_time, L - 1, num_neighbors)
    ngh_nodes, ngh_eidx, ngh_t = mock_get_temporal_neighbor(
        src_idx, cut_time, num_neighbors, cfg['num_nodes'], cfg['num_edges'])
    dt = jnp.asarray((cut_time[:, None] - ngh_t).astype(np.float32))
    ngh_conv = _ref_tem_conv(params, cfg, ngh_nodes.flatten(), ngh_t.flatten(),
                             L - 1, num_neighbors)
    ngh_feat = ngh_conv.reshape(B, num_neighbors, D)
    edge_emb = params['edge_table'][jnp.asarray(ngh_eidx.reshape(-1), jnp.int32)]
    ngh_edge = jnp.dot(edge_emb, params['edge_w'], precision=_HP).reshape(B, num_neighbors, D)
    mask_bool = jnp.asarray(ngh_nodes == 0)
    return _ref_attn_layer(params, cfg, src_conv, ngh_feat, ngh_edge, dt, mask_bool)


# ----------------------------------------------------------------------------
# Deterministic parameter construction (mirrors TGNN_Encoder.__init__ shapes)
# ----------------------------------------------------------------------------
def make_params(key, cfg):
    feat_dim = cfg['feat_dim']
    D = cfg['embedding_dim']
    T = cfg['time_embedding_dim']
    M = 2 * D + T

    ks = jax.random.split(key, 8)

    def xavier(k, shape):
        fan_out, fan_in = shape[0], shape[1]
        std = np.sqrt(2.0 / (fan_in + fan_out))
        return (jax.random.normal(k, shape, jnp.float32) * std).astype(jnp.float32)

    return {
        'node_table': jax.random.normal(ks[0], (cfg['num_nodes'], feat_dim), jnp.float32) * 0.5,
        'edge_table': jax.random.normal(ks[1], (cfg['num_edges'], feat_dim), jnp.float32) * 0.5,
        'node_w': xavier(ks[2], (feat_dim, D)),
        'edge_w': xavier(ks[3], (feat_dim, D)),
        'agg_fc_w1': xavier(ks[4], (2 * D, M + D)),
        'agg_fc_w2': xavier(ks[5], (D, 2 * D)),
        'fc_w': xavier(ks[6], (M, M)),
        'shared_attn': xavier(ks[7], (1, 2 * M)),
        'ln_w': jnp.ones((M,), jnp.float32),
        'ln_b': jnp.zeros((M,), jnp.float32),
        'basis_freq': jnp.asarray(1.0 / 10 ** np.linspace(0, 9, T), jnp.float32),
        'phase': jnp.zeros((T,), jnp.float32),
    }


# ----------------------------------------------------------------------------
if __name__ == "__main__":
    cfg = {
        'num_layers': 2,
        'embedding_dim': 16,          # n_feat_dim == e_feat_dim
        'time_embedding_dim': 16,     # time_dim   -> model_dim = 48
        'feat_dim': 16,               # raw node/edge feature dim
        'num_nodes': 32,
        'num_edges': 40,
    }
    num_neighbors = 4

    key = jax.random.PRNGKey(0)
    params = make_params(key, cfg)
    consts = prepare_consts(params, cfg)

    src_idx_l = np.array([1, 5, 9, 13], dtype=np.int64)
    target_idx_l = np.array([2, 6, 10, 14], dtype=np.int64)
    cut_time_l = np.array([10.0, 20.0, 30.0, 40.0], dtype=np.float32)

    src_embed, target_embed = tgnn_forward(consts, cfg, src_idx_l, target_idx_l,
                                           cut_time_l, num_neighbors)
    jax.block_until_ready((src_embed, target_embed))
    assert src_embed.shape == (4, cfg['embedding_dim'])
    assert target_embed.shape == (4, cfg['embedding_dim'])

    # validate the fused / batched Pallas path against a pure-JAX reference
    ref_src = _ref_tem_conv(params, cfg, src_idx_l, cut_time_l, cfg['num_layers'], num_neighbors)
    ref_tgt = _ref_tem_conv(params, cfg, target_idx_l, cut_time_l, cfg['num_layers'], num_neighbors)
    np.testing.assert_allclose(np.asarray(src_embed), np.asarray(ref_src), rtol=2e-2, atol=2e-2)
    np.testing.assert_allclose(np.asarray(target_embed), np.asarray(ref_tgt), rtol=2e-2, atol=2e-2)

    print("KERNEL_OK")
</pallas_src>

<mosaic_0001>
module attributes {stable_mosaic.version = 11 : i64} {
  func.func @_proj_kernel(%arg0: i32, %arg1: memref<32x16xf32, #tpu.memory_space<vmem>>, %arg2: memref<16x16xf32, #tpu.memory_space<vmem>>, %arg3: memref<32x16xf32, #tpu.memory_space<vmem>>) attributes {dimension_semantics = [#tpu.dimension_semantics<parallel>], iteration_bounds = array<i64: 1>, scalar_prefetch = 0 : i64, scratch_operands = 0 : i64, tpu.core_type = #tpu.core_type<tc>, window_params = [{transform_indices = @transform_0, window_bounds = array<i64: 32, 16>}, {pipeline_mode = #tpu.pipeline_mode<synchronous>, transform_indices = @transform_1, window_bounds = array<i64: 16, 16>}, {transform_indices = @transform_2, window_bounds = array<i64: 32, 16>}]} {
    %c0 = arith.constant 0 : index
    %c0_0 = arith.constant 0 : index
    %0 = vector.load %arg1[%c0, %c0_0] : memref<32x16xf32, #tpu.memory_space<vmem>>, vector<32x16xf32>
    %c0_1 = arith.constant 0 : index
    %c0_2 = arith.constant 0 : index
    %1 = vector.load %arg2[%c0_1, %c0_2] : memref<16x16xf32, #tpu.memory_space<vmem>>, vector<16x16xf32>
    %cst = arith.constant dense<0.000000e+00> : vector<32x16xf32>
    %2 = tpu.matmul %0, %1, %cst {dimension_numbers = #tpu.dot_dimension_numbers<[1], [0], [0], [1], [0, 0, 1, 1], [], []>} : vector<32x16xf32>, vector<16x16xf32>, vector<32x16xf32> -> vector<32x16xf32>
    %c0_3 = arith.constant 0 : index
    %c0_4 = arith.constant 0 : index
    %3 = vector.load %arg3[%c0_3, %c0_4] : memref<32x16xf32, #tpu.memory_space<vmem>>, vector<32x16xf32>
    tpu.vector_store %arg3[%c0_3, %c0_4], %2 {strides = array<i32>} : memref<32x16xf32, #tpu.memory_space<vmem>>, vector<32x16xf32>,
    return
  }
  func.func @transform_0(%arg0: i32) -> (i32, i32) {
    %c0_i32 = arith.constant 0 : i32
    %c0_i32_0 = arith.constant 0 : i32
    return %arg0, %c0_i32 : i32, i32
  }
  func.func @transform_1(%arg0: i32) -> (i32, i32) {
    %c0_i32 = arith.constant 0 : i32
    %c0_i32_0 = arith.constant 0 : i32
    %c0_i32_1 = arith.constant 0 : i32
    return %c0_i32, %c0_i32_0 : i32, i32
  }
  func.func @transform_2(%arg0: i32) -> (i32, i32) {
    %c0_i32 = arith.constant 0 : i32
    %c0_i32_0 = arith.constant 0 : i32
    return %arg0, %c0_i32 : i32, i32
  }
}

</mosaic_0001>

<bundles_post_ra>
// kernel: tpu_custom_call.1
= control target key start
LH: loop header
LB: loop body
LE: loop exit
PB: predicated region body
PF: predicated region fallthrough
CT: control target
= control target key end

     0   :  { %vm17_vm0 = vcmask 130048   ;;  %s202_s1 = inlined_call_operand.vmem [shape: f32[16,16], index: 1, kind: input, shape index: {}]   ;;  %s203_s0 = inlined_call_operand.vmem [shape: f32[32,16], index: 0, kind: input, shape index: {}]   ;;  %s204_s2 = inlined_call_operand.vmem [shape: f32[32,16], index: 2, kind: output, shape index: {}]  }
   0x1   :  { %v15_v0 = vld [vmem:[%s202_s1] sm:$0xff]  ;;  %v16_v1 = vld [vmem:[%s202_s1 + $0x8] sm:$0xff]  ;;  %v13_v4 = vld [vmem:[%s203_s0 + $0x10] sm:$0xff] }
   0x2   :  { %v11_v2 = vld [vmem:[%s203_s0] sm:$0xff]  ;;  %v143_v3 = vpack.c.bf16 %v16_v1, %v15_v0  ;;  %140 = vmatprep.mubr.msk.f32.mxu1 %vm17_vm0, %v13_v4  ;;  %v12_v5 = vld [vmem:[%s203_s0 + $0x8] sm:$0xff]  ;;  %v14_v6 = vld [vmem:[%s203_s0 + $0x18] sm:$0xff] }
   0x3   :  { %137 = vmatprep.mubr.msk.f32.mxu0 %vm17_vm0, %v11_v2 }
   0x4   :  { %144 = vmatprep.subr.bf16.mxu0 %v143_v3  ;;  %147 = vmatprep.subr.bf16.mxu1 %v143_v3 }
   0x5   :  { %146 = vmatpush3.bf16.msra.mxu0 %v143_v3  ;;  %148 = vmatpush3.bf16.msra.mxu1 %v143_v3 }
   0x8   :  { %138 = vmatmul.mubr.msk.f32.vlgmr.msra.gmra.mrb[0].mxu0 %vm17_vm0, %v12_v5  ;;  %141 = vmatmul.mubr.msk.f32.vlgmr.msra.gmra.mrb[0].mxu1 %vm17_vm0, %v14_v6 }
  0xdb   :  { %v139_v7 = vpop.f32.mrb[0].mxu0  ;;  %v142_v8 = vpop.f32.mrb[0].mxu1 }
  0xdc   :  { %116 = vst.msk [vmem:[%s204_s2 + $0x8] sm:$0xff] %vm17_vm0, %v139_v7  ;;  %118 = vst.msk [vmem:[%s204_s2 + $0x18] sm:$0xff] %vm17_vm0, %v142_v8  ;;  %v96_v9 = vpop.f32.mrb[1].mxu0  ;;  %v106_v10 = vpop.f32.mrb[1].mxu1 }
  0xdd   :  { %115 = vst.msk [vmem:[%s204_s2] sm:$0xff] %vm17_vm0, %v96_v9  ;;  %117 = vst.msk [vmem:[%s204_s2 + $0x10] sm:$0xff] %vm17_vm0, %v106_v10 }

</bundles_post_ra>
